<compile_context>
chip_gen: v7x
topology: tpu7x:2x2x1
jax: 0.10.0
libtpu: 0.0.40
codegen_flags: <defaults>
</compile_context>

<pallas_src>
import math
import re
import functools

import numpy as np
import jax
import jax.numpy as jnp
from jax.experimental import pallas as pl
from jax.experimental.pallas import tpu as pltpu


def _tpu_generation() -> int:
    """Best-effort TPU generation from device_kind ('TPU v5e' -> 5, 'TPU7x' -> 7)."""
    try:
        kind = jax.devices()[0].device_kind.lower()
    except Exception:
        return 0
    m = re.search(r"(\d+)", kind)
    return int(m.group(1)) if m else 0


def _pick_tile(dim, target, mult):
    """Largest divisor of `dim` that is <= target and a multiple of `mult`;
    falls back to the full dim (a block equal to the full axis is always legal)."""
    if dim <= target:
        return dim
    for t in range(target, mult - 1, -1):
        if dim % t == 0 and t % mult == 0:
            return t
    return dim


# ---------------------------------------------------------------------------
# Kernel A: fused QKV projection + flattened RMSNorm + interleaved RoPE
# ---------------------------------------------------------------------------
def _qkv_rope_kernel(x_ref, wqkv_ref, qw_ref, kw_ref, cos_ref, sin_ref,
                     q_ref, kt_ref, v_ref,
                     *, eps, n_heads, n_kv_heads, head_dim, q_scale):
    q_width = n_heads * head_dim
    kv_width = n_kv_heads * head_dim

    x = x_ref[...]                                                      # (ts, D) bf16
    qkv = jnp.dot(x, wqkv_ref[...], preferred_element_type=jnp.float32)  # (ts, qw+2kvw)
    q = qkv[:, :q_width]
    k = qkv[:, q_width:q_width + kv_width]
    v = qkv[:, q_width + kv_width:]

    # TODO(synk): RMSNorm is taken over the *flattened* n_heads*head_dim axis with a
    # per-head-tiled weight, matching the quirky PyTorch source (its (head_dim,)
    # weight only broadcasts literally when n_heads == 1).
    def rmsnorm(t, w):
        ms = jnp.mean(t * t, axis=-1, keepdims=True)
        return t * jax.lax.rsqrt(ms + eps) * w

    q = rmsnorm(q, qw_ref[...])     # qw_ref: (1, H*hd)  f32
    k = rmsnorm(k, kw_ref[...])     # kw_ref: (1, Hk*hd) f32

    # RoPE tables arrive at (ts, head_dim); tile across heads in-kernel with cheap
    # lane copies instead of DMAing full-width f32 tables from HBM.
    cos_hd = cos_ref[...]           # (ts, hd): each freq duplicated over its lane pair
    sin_hd = sin_ref[...]           # (ts, hd): sign folded (even lanes carry -sin)
    if n_heads > 1:
        cos_q = jnp.concatenate([cos_hd] * n_heads, axis=-1)            # (ts, H*hd)
        sin_q = jnp.concatenate([sin_hd] * n_heads, axis=-1)
    else:
        cos_q, sin_q = cos_hd, sin_hd

    def rope(t, c, s):
        w = t.shape[-1]
        lane = jax.lax.broadcasted_iota(jnp.int32, t.shape, 1)
        # swapped[2i] = t[2i+1], swapped[2i+1] = t[2i].  Pairs never cross a head
        # boundary, so one full-width select + two XLU rolls cover every head.
        swapped = jnp.where((lane % 2) == 0,
                            pltpu.roll(t, shift=w - 1, axis=1),   # take lane l+1
                            pltpu.roll(t, shift=1, axis=1))       # take lane l-1
        return t * c + swapped * s

    q = rope(q, cos_q, sin_q) * q_scale                # fold 1/sqrt(hd) (RoPE is linear)
    k = rope(k, cos_q[:, :kv_width], sin_q[:, :kv_width])

    q_ref[...] = q.astype(jnp.bfloat16)                # (ts, H*hd)
    kt_ref[...] = k.astype(jnp.bfloat16).T             # cast first: half the XLU work
    v_ref[...] = v.astype(jnp.bfloat16)                # (ts, Hk*hd)


def _qkv_rope(x_bf, wqkv_t, qw, kw, cos_hd, sin_hd, *,
              n_heads, n_kv_heads, head_dim, eps, ts, vmem_limit):
    B, S, D = x_bf.shape
    q_width = n_heads * head_dim
    kv_width = n_kv_heads * head_dim
    n_sb = S // ts

    kernel = functools.partial(
        _qkv_rope_kernel, eps=eps, n_heads=n_heads, n_kv_heads=n_kv_heads,
        head_dim=head_dim, q_scale=1.0 / math.sqrt(head_dim))
    const = lambda b, s: (0, 0)

    return pl.pallas_call(
        kernel,
        out_shape=(
            jax.ShapeDtypeStruct((B, S, q_width), jnp.bfloat16),     # q (roped, scaled)
            jax.ShapeDtypeStruct((B, kv_width, S), jnp.bfloat16),    # k^T (roped)
            jax.ShapeDtypeStruct((B, S, kv_width), jnp.bfloat16),    # v
        ),
        grid_spec=pltpu.PrefetchScalarGridSpec(
            num_scalar_prefetch=0,
            grid=(B, n_sb),
            in_specs=[
                pl.BlockSpec((pl.Squeezed(), ts, D), lambda b, s: (b, s, 0)),
                # TODO(synk): pipeline_mode=pl.Buffered(1) would drop the second
                # (never-used) buffer of this constant-index weight block.
                pl.BlockSpec(wqkv_t.shape, const),
                pl.BlockSpec(qw.shape, const),
                pl.BlockSpec(kw.shape, const),
                pl.BlockSpec((ts, head_dim), lambda b, s: (s, 0)),   # cos (S, hd)
                pl.BlockSpec((ts, head_dim), lambda b, s: (s, 0)),   # sin (S, hd)
            ],
            out_specs=(
                pl.BlockSpec((pl.Squeezed(), ts, q_width), lambda b, s: (b, s, 0)),
                pl.BlockSpec((pl.Squeezed(), kv_width, ts), lambda b, s: (b, 0, s)),
                pl.BlockSpec((pl.Squeezed(), ts, kv_width), lambda b, s: (b, s, 0)),
            ),
        ),
        compiler_params=pltpu.CompilerParams(
            dimension_semantics=("parallel", "parallel"),
            vmem_limit_bytes=vmem_limit),
    )(x_bf, wqkv_t, qw, kw, cos_hd, sin_hd)


# ---------------------------------------------------------------------------
# Kernel B: flash-style causal attention over GQA groups + fused output proj
# ---------------------------------------------------------------------------
def _flash_attn_kernel(q_ref, kt_ref, v_ref, wo_ref, o_ref,
                       m_scr, l_scr, acc_scr, og_scr,
                       *, tq, tk, n_rep, head_dim, exp_bf16):
    qi = pl.program_id(1)
    g = pl.program_id(2)
    ki = pl.program_id(3)
    n_kb = pl.num_programs(3)
    hd = head_dim

    # Output block index is constant across (g, ki): it stays resident in VMEM, so
    # accumulate the fused output projection straight into it (no extra scratch).
    @pl.when((g == 0) & (ki == 0))
    def _():
        o_ref[...] = jnp.zeros_like(o_ref)

    @pl.when(ki == 0)
    def _():
        m_scr[...] = jnp.full_like(m_scr, -1e30)
        l_scr[...] = jnp.zeros_like(l_scr)
        acc_scr[...] = jnp.zeros_like(acc_scr)

    q_start = qi * tq
    k_start = ki * tk

    def process(masked):
        kt = kt_ref[...]                    # (hd, tk)  shared by all heads in the group
        v = v_ref[...]                      # (tk, hd)
        if masked:
            # Mask built from a (tq,1) x (1,tk) broadcast; only diagonal tiles pay.
            row = q_start + jax.lax.broadcasted_iota(jnp.int32, (tq, 1), 0)
            col = k_start + jax.lax.broadcasted_iota(jnp.int32, (1, tk), 1)
            visible = col <= row
        for r in range(n_rep):              # static unroll over the GQA group
            # q already carries the 1/sqrt(hd) scale (folded in kernel A).
            s = jnp.dot(q_ref[:, r * hd:(r + 1) * hd], kt,
                        preferred_element_type=jnp.float32)             # (tq, tk) f32
            if masked:
                # Finite fill: ki always starts at 0, so every row has already seen
                # an unmasked column => l > 0, no NaNs at normalization time.
                s = jnp.where(visible, s, -1e30)
            m_prev = m_scr[r]
            m_new = jnp.maximum(m_prev, jnp.max(s, axis=-1, keepdims=True))
            alpha = jnp.exp(m_prev - m_new)
            if exp_bf16:
                # bf16 exp roughly doubles EUP throughput on v6e/v7x; sums stay f32.
                p = jnp.exp((s - m_new).astype(jnp.bfloat16))
                l_scr[r] = alpha * l_scr[r] + jnp.sum(
                    p.astype(jnp.float32), axis=-1, keepdims=True)
                pv = jnp.dot(p, v, preferred_element_type=jnp.float32)
            else:
                p = jnp.exp(s - m_new)
                l_scr[r] = alpha * l_scr[r] + jnp.sum(p, axis=-1, keepdims=True)
                pv = jnp.dot(p.astype(jnp.bfloat16), v,
                             preferred_element_type=jnp.float32)
            acc_scr[r] = alpha * acc_scr[r] + pv
            m_scr[r] = m_new

    # Fully-visible KV tile: skip all masking work.
    @pl.when(k_start + tk - 1 <= q_start)
    def _():
        process(masked=False)

    # Diagonal-straddling KV tile: build and apply the causal mask.
    @pl.when((k_start + tk - 1 > q_start) & (k_start <= q_start + tq - 1))
    def _():
        process(masked=True)

    # KV tiles entirely above the diagonal are skipped; their DMA block index is
    # clamped in the index_map so no extra HBM traffic is issued.

    @pl.when(ki == n_kb - 1)
    def _():
        for r in range(n_rep):
            inv_l = pl.reciprocal(l_scr[r], approx=True)
            og_scr[:, r * hd:(r + 1) * hd] = (acc_scr[r] * inv_l).astype(jnp.bfloat16)
        # One (tq, n_rep*hd) @ (n_rep*hd, D) matmul: K = n_rep*128 fully feeds the
        # 256-wide MXU on v6e/v7x.
        o_ref[...] += jnp.dot(og_scr[...], wo_ref[...],
                              preferred_element_type=jnp.float32)


def _flash_attention(q, kt, v, wo_t, *, n_heads, n_kv_heads, head_dim,
                     out_dim, tq, tk, exp_bf16, vmem_limit):
    B, S, _ = q.shape
    hd = head_dim
    n_rep = n_heads // n_kv_heads
    n_qb = S // tq
    n_kb = S // tk

    def kv_block(qi, ki):
        # Clamp fully-masked KV tiles to the last useful one: the pipeline skips
        # re-fetching a block whose index did not change (saves HBM traffic).
        return jnp.minimum(ki, (qi * tq + tq - 1) // tk)

    kernel = functools.partial(_flash_attn_kernel, tq=tq, tk=tk, n_rep=n_rep,
                               head_dim=hd, exp_bf16=exp_bf16)

    return pl.pallas_call(
        kernel,
        out_shape=jax.ShapeDtypeStruct((B, S, out_dim), jnp.float32),
        grid_spec=pltpu.PrefetchScalarGridSpec(
            num_scalar_prefetch=0,
            grid=(B, n_qb, n_kv_heads, n_kb),
            in_specs=[
                # whole GQA group of q heads (contiguous: head h uses kv head h//n_rep)
                pl.BlockSpec((pl.Squeezed(), tq, n_rep * hd),
                             lambda b, qi, g, ki: (b, qi, g)),
                pl.BlockSpec((pl.Squeezed(), hd, tk),
                             lambda b, qi, g, ki: (b, g, kv_block(qi, ki))),
                pl.BlockSpec((pl.Squeezed(), tk, hd),
                             lambda b, qi, g, ki: (b, kv_block(qi, ki), g)),
                pl.BlockSpec((n_rep * hd, out_dim), lambda b, qi, g, ki: (g, 0)),
            ],
            out_specs=pl.BlockSpec((pl.Squeezed(), tq, out_dim),
                                   lambda b, qi, g, ki: (b, qi, 0)),
            scratch_shapes=[
                pltpu.VMEM((n_rep, tq, 1), jnp.float32),     # running max (per head)
                pltpu.VMEM((n_rep, tq, 1), jnp.float32),     # running denom (per head)
                pltpu.VMEM((n_rep, tq, hd), jnp.float32),    # per-head accumulator
                pltpu.VMEM((tq, n_rep * hd), jnp.bfloat16),  # normalized group output
            ],
        ),
        compiler_params=pltpu.CompilerParams(
            dimension_semantics=("parallel", "parallel", "arbitrary", "arbitrary"),
            vmem_limit_bytes=vmem_limit),
    )(q, kt, v, wo_t)


# ---------------------------------------------------------------------------
# Public wrapper
# ---------------------------------------------------------------------------
def attention_forward(x, wq, wk, wv, wo, q_norm_w, k_norm_w,
                      freqs_cos, freqs_sin, *,
                      n_heads, n_kv_heads, head_dim, eps=1e-6):
    B, S, D = x.shape
    hd = head_dim
    assert n_heads % n_kv_heads == 0

    # Generation-dependent tiling / VMEM budget (v7x: 64 MiB VMEM, 2 TCs => smaller
    # tiles, which also keeps the parallel grid extents larger for both cores).
    gen = _tpu_generation()
    if gen >= 7:
        vmem_limit = 32 * 1024 * 1024
        ts = _pick_tile(S, 256, 128)
        tq = _pick_tile(S, 256, 16)
        tk = _pick_tile(S, 512, 128)
    else:  # v5e / v6e (128 MiB physical VMEM)
        vmem_limit = 48 * 1024 * 1024
        ts = _pick_tile(S, 512, 128)
        tq = _pick_tile(S, 512, 16)
        tk = _pick_tile(S, 1024, 128)
    exp_bf16 = gen >= 6        # v5e has no bf16 EUP; keep f32 exp there

    # nn.Linear stores (out, in); present (in, out), bf16 for the MXU.  Single
    # concatenated QKV weight => one buffer pair + one MXU weight-push stream.
    wqkv_t = jnp.concatenate([wq.T, wk.T, wv.T], axis=1).astype(jnp.bfloat16)
    wo_t = wo.T.astype(jnp.bfloat16)                               # (H*hd, D)

    # Pad the output dim to a lane-dense multiple of 128 (zero columns in wo),
    # so Kernel B's output stores are unmasked vst; sliced back off outside.
    D_pad = ((D + 127) // 128) * 128
    if D_pad != D:
        wo_t = jnp.pad(wo_t, ((0, 0), (0, D_pad - D)))

    # RMSNorm weights tiled to the flattened projection width (f32 elementwise path).
    qw = jnp.tile(q_norm_w.astype(jnp.float32), n_heads)[None, :]        # (1, H*hd)
    kw = jnp.tile(k_norm_w.astype(jnp.float32), n_kv_heads)[None, :]     # (1, Hk*hd)

    # RoPE tables at (S, head_dim) only (tiled across heads inside the kernel):
    # duplicate each frequency over its lane pair, fold the rotation sign into sin.
    cos_hd = jnp.repeat(freqs_cos.astype(jnp.float32), 2, axis=-1)       # (S, hd)
    sin_hd = jnp.repeat(freqs_sin.astype(jnp.float32), 2, axis=-1)       # (S, hd)
    sign = jnp.tile(jnp.array([-1.0, 1.0], jnp.float32), hd // 2)        # (hd,)
    sin_hd = sin_hd * sign[None, :]

    x_bf = x.astype(jnp.bfloat16)      # halve x HBM read + VMEM block size

    q, kt, v = _qkv_rope(x_bf, wqkv_t, qw, kw, cos_hd, sin_hd,
                         n_heads=n_heads, n_kv_heads=n_kv_heads,
                         head_dim=hd, eps=eps, ts=ts, vmem_limit=vmem_limit)

    out = _flash_attention(q, kt, v, wo_t,
                           n_heads=n_heads, n_kv_heads=n_kv_heads, head_dim=hd,
                           out_dim=D_pad, tq=tq, tk=tk,
                           exp_bf16=exp_bf16, vmem_limit=vmem_limit)
    if D_pad != D:
        out = out[..., :D]
    return out


# ---------------------------------------------------------------------------
# Pure-JAX reference (mirrors the PyTorch forward, same q/k-norm interpretation)
# ---------------------------------------------------------------------------
def _reference(x, wq, wk, wv, wo, q_norm_w, k_norm_w, freqs_cos, freqs_sin,
               *, n_heads, n_kv_heads, head_dim, eps=1e-6):
    B, S, D = x.shape
    hd = head_dim
    n_rep = n_heads // n_kv_heads

    def rms(t, w_full):
        ms = jnp.mean(t * t, axis=-1, keepdims=True)
        return t * jax.lax.rsqrt(ms + eps) * w_full

    xq = rms(x @ wq.T, jnp.tile(q_norm_w, n_heads))
    xk = rms(x @ wk.T, jnp.tile(k_norm_w, n_kv_heads))
    xv = x @ wv.T
    xq = xq.reshape(B, S, n_heads, hd)
    xk = xk.reshape(B, S, n_kv_heads, hd)
    xv = xv.reshape(B, S, n_kv_heads, hd)

    def rope(t):
        r, i = t[..., 0::2], t[..., 1::2]
        c = freqs_cos[None, :, None, :]
        s = freqs_sin[None, :, None, :]
        out_r = r * c - i * s
        out_i = r * s + i * c
        return jnp.stack([out_r, out_i], axis=-1).reshape(t.shape)

    xq, xk = rope(xq), rope(xk)
    xk = jnp.repeat(xk, n_rep, axis=2)
    xv = jnp.repeat(xv, n_rep, axis=2)
    xq, xk, xv = (a.transpose(0, 2, 1, 3) for a in (xq, xk, xv))   # (B,H,S,hd)

    scores = jnp.einsum("bhqd,bhkd->bhqk", xq, xk) / math.sqrt(hd)
    mask = jnp.tril(jnp.ones((S, S), dtype=bool))
    scores = jnp.where(mask[None, None], scores, -jnp.inf)
    probs = jax.nn.softmax(scores, axis=-1)
    out = jnp.einsum("bhqk,bhkd->bhqd", probs, xv)
    out = out.transpose(0, 2, 1, 3).reshape(B, S, n_heads * hd)
    return out @ wo.T


if __name__ == "__main__":
    # Small config consistent with the module (head_dim is hard-coded to 128 there).
    B, S, DIM = 2, 8, 32
    N_HEADS, N_KV_HEADS, HEAD_DIM = 2, 1, 128
    EPS = 1e-6

    key = jax.random.PRNGKey(0)
    ks = jax.random.split(key, 8)
    x = jax.random.normal(ks[0], (B, S, DIM), dtype=jnp.float32)
    wq = 0.05 * jax.random.normal(ks[1], (N_HEADS * HEAD_DIM, DIM), dtype=jnp.float32)
    wk = 0.05 * jax.random.normal(ks[2], (N_KV_HEADS * HEAD_DIM, DIM), dtype=jnp.float32)
    wv = 0.05 * jax.random.normal(ks[3], (N_KV_HEADS * HEAD_DIM, DIM), dtype=jnp.float32)
    wo = 0.05 * jax.random.normal(ks[4], (DIM, N_HEADS * HEAD_DIM), dtype=jnp.float32)
    q_norm_w = 1.0 + 0.1 * jax.random.normal(ks[5], (HEAD_DIM,), dtype=jnp.float32)
    k_norm_w = 1.0 + 0.1 * jax.random.normal(ks[6], (HEAD_DIM,), dtype=jnp.float32)

    # rotary tables, shape (seqlen, head_dim // 2) as required by apply_rotary_emb
    inv_freq = 1.0 / (10000.0 ** (jnp.arange(0, HEAD_DIM, 2, dtype=jnp.float32) / HEAD_DIM))
    angles = jnp.arange(S, dtype=jnp.float32)[:, None] * inv_freq[None, :]
    freqs_cos = jnp.cos(angles)
    freqs_sin = jnp.sin(angles)

    out = attention_forward(x, wq, wk, wv, wo, q_norm_w, k_norm_w,
                            freqs_cos, freqs_sin,
                            n_heads=N_HEADS, n_kv_heads=N_KV_HEADS,
                            head_dim=HEAD_DIM, eps=EPS)
    out = jax.block_until_ready(out)

    ref = _reference(x, wq, wk, wv, wo, q_norm_w, k_norm_w, freqs_cos, freqs_sin,
                     n_heads=N_HEADS, n_kv_heads=N_KV_HEADS,
                     head_dim=HEAD_DIM, eps=EPS)
    np.testing.assert_allclose(np.asarray(out), np.asarray(ref), rtol=2e-2, atol=2e-2)

    print("KERNEL_OK")
</pallas_src>

<mosaic_0001>
module attributes {stable_mosaic.version = 11 : i64} {
  func.func @_qkv_rope_kernel(%arg0: i32, %arg1: i32, %arg2: memref<1x8x32xbf16, #tpu.memory_space<vmem>>, %arg3: memref<32x512xbf16, #tpu.memory_space<vmem>>, %arg4: memref<1x256xf32, #tpu.memory_space<vmem>>, %arg5: memref<1x128xf32, #tpu.memory_space<vmem>>, %arg6: memref<8x128xf32, #tpu.memory_space<vmem>>, %arg7: memref<8x128xf32, #tpu.memory_space<vmem>>, %arg8: memref<1x8x256xbf16, #tpu.memory_space<vmem>>, %arg9: memref<1x128x8xbf16, #tpu.memory_space<vmem>>, %arg10: memref<1x8x128xbf16, #tpu.memory_space<vmem>>) attributes {dimension_semantics = [#tpu.dimension_semantics<parallel>, #tpu.dimension_semantics<parallel>], iteration_bounds = array<i64: 2, 1>, scalar_prefetch = 0 : i64, scratch_operands = 0 : i64, tpu.core_type = #tpu.core_type<tc>, window_params = [{transform_indices = @transform_0, window_bounds = array<i64: 1, 8, 32>}, {pipeline_mode = #tpu.pipeline_mode<synchronous>, transform_indices = @transform_1, window_bounds = array<i64: 32, 512>}, {pipeline_mode = #tpu.pipeline_mode<synchronous>, transform_indices = @transform_2, window_bounds = array<i64: 1, 256>}, {pipeline_mode = #tpu.pipeline_mode<synchronous>, transform_indices = @transform_3, window_bounds = array<i64: 1, 128>}, {transform_indices = @transform_4, window_bounds = array<i64: 8, 128>}, {transform_indices = @transform_5, window_bounds = array<i64: 8, 128>}, {transform_indices = @transform_6, window_bounds = array<i64: 1, 8, 256>}, {transform_indices = @transform_7, window_bounds = array<i64: 1, 128, 8>}, {transform_indices = @transform_8, window_bounds = array<i64: 1, 8, 128>}]} {
    %c0 = arith.constant 0 : index
    %c0_0 = arith.constant 0 : index
    %c0_1 = arith.constant 0 : index
    %0 = vector.load %arg2[%c0, %c0_0, %c0_1] : memref<1x8x32xbf16, #tpu.memory_space<vmem>>, vector<1x8x32xbf16>
    %1 = vector.shape_cast %0 : vector<1x8x32xbf16> to vector<8x32xbf16>
    %c0_2 = arith.constant 0 : index
    %c0_3 = arith.constant 0 : index
    %2 = vector.load %arg3[%c0_2, %c0_3] : memref<32x512xbf16, #tpu.memory_space<vmem>>, vector<32x512xbf16>
    %cst = arith.constant dense<0.000000e+00> : vector<8x512xf32>
    %3 = tpu.matmul %1, %2, %cst {dimension_numbers = #tpu.dot_dimension_numbers<[1], [0], [0], [1], [0, 0, 1, 1], [], []>} : vector<8x32xbf16>, vector<32x512xbf16>, vector<8x512xf32> -> vector<8x512xf32>
    %4 = vector.extract_strided_slice %3 {offsets = [0, 0], sizes = [8, 256], strides = [1, 1]} : vector<8x512xf32> to vector<8x256xf32>
    %5 = vector.extract_strided_slice %3 {offsets = [0, 256], sizes = [8, 128], strides = [1, 1]} : vector<8x512xf32> to vector<8x128xf32>
    %6 = vector.extract_strided_slice %3 {offsets = [0, 384], sizes = [8, 128], strides = [1, 1]} : vector<8x512xf32> to vector<8x128xf32>
    %c0_4 = arith.constant 0 : index
    %c0_5 = arith.constant 0 : index
    %7 = vector.load %arg4[%c0_4, %c0_5] : memref<1x256xf32, #tpu.memory_space<vmem>>, vector<1x256xf32>
    %8 = arith.mulf %4, %4 : vector<8x256xf32>
    %cst_6 = arith.constant dense<0.000000e+00> : vector<8xf32>
    %9 = vector.multi_reduction <add>, %8, %cst_6 [1] : vector<8x256xf32> to vector<8xf32>
    %10 = vector.shape_cast %9 : vector<8xf32> to vector<8x1xf32>
    %cst_7 = arith.constant 2.560000e+02 : f32
    %11 = vector.broadcast %cst_7 : f32 to vector<8x1xf32>
    %12 = arith.divf %10, %11 : vector<8x1xf32>
    %cst_8 = arith.constant 9.99999997E-7 : f32
    %13 = vector.broadcast %cst_8 : f32 to vector<8x1xf32>
    %14 = arith.addf %12, %13 : vector<8x1xf32>
    %15 = math.rsqrt %14 : vector<8x1xf32>
    %16 = vector.broadcast %15 : vector<8x1xf32> to vector<8x256xf32>
    %17 = arith.mulf %4, %16 : vector<8x256xf32>
    %18 = vector.broadcast %7 : vector<1x256xf32> to vector<8x256xf32>
    %19 = arith.mulf %17, %18 : vector<8x256xf32>
    %c0_9 = arith.constant 0 : index
    %c0_10 = arith.constant 0 : index
    %20 = vector.load %arg5[%c0_9, %c0_10] : memref<1x128xf32, #tpu.memory_space<vmem>>, vector<1x128xf32>
    %21 = arith.mulf %5, %5 : vector<8x128xf32>
    %cst_11 = arith.constant dense<0.000000e+00> : vector<8xf32>
    %22 = vector.multi_reduction <add>, %21, %cst_11 [1] : vector<8x128xf32> to vector<8xf32>
    %23 = vector.shape_cast %22 : vector<8xf32> to vector<8x1xf32>
    %cst_12 = arith.constant 1.280000e+02 : f32
    %24 = vector.broadcast %cst_12 : f32 to vector<8x1xf32>
    %25 = arith.divf %23, %24 : vector<8x1xf32>
    %cst_13 = arith.constant 9.99999997E-7 : f32
    %26 = vector.broadcast %cst_13 : f32 to vector<8x1xf32>
    %27 = arith.addf %25, %26 : vector<8x1xf32>
    %28 = math.rsqrt %27 : vector<8x1xf32>
    %29 = vector.broadcast %28 : vector<8x1xf32> to vector<8x128xf32>
    %30 = arith.mulf %5, %29 : vector<8x128xf32>
    %31 = vector.broadcast %20 : vector<1x128xf32> to vector<8x128xf32>
    %32 = arith.mulf %30, %31 : vector<8x128xf32>
    %c0_14 = arith.constant 0 : index
    %c0_15 = arith.constant 0 : index
    %33 = vector.load %arg6[%c0_14, %c0_15] : memref<8x128xf32, #tpu.memory_space<vmem>>, vector<8x128xf32>
    %c0_16 = arith.constant 0 : index
    %c0_17 = arith.constant 0 : index
    %34 = vector.load %arg7[%c0_16, %c0_17] : memref<8x128xf32, #tpu.memory_space<vmem>>, vector<8x128xf32>
    %35 = tpu.concatenate %33, %33 in 1 : vector<8x128xf32>, vector<8x128xf32> -> vector<8x256xf32>
    %36 = tpu.concatenate %34, %34 in 1 : vector<8x128xf32>, vector<8x128xf32> -> vector<8x256xf32>
    %37 = tpu.iota {dimensions = array<i32: 1>} : vector<8x256xi32>
    %c2_i32 = arith.constant 2 : i32
    %c0_i32 = arith.constant 0 : i32
    %38 = arith.cmpi eq, %c2_i32, %c0_i32 : i32
    %c1_i32 = arith.constant 1 : i32
    %39 = arith.select %38, %c1_i32, %c2_i32 : i32
    %40 = vector.broadcast %39 : i32 to vector<8x256xi32>
    %41 = arith.remsi %37, %40 : vector<8x256xi32>
    %c0_i32_18 = arith.constant 0 : i32
    %42 = vector.broadcast %c0_i32_18 : i32 to vector<8x256xi32>
    %43 = arith.cmpi ne, %41, %42 : vector<8x256xi32>
    %c0_i32_19 = arith.constant 0 : i32
    %44 = vector.broadcast %c0_i32_19 : i32 to vector<8x256xi32>
    %45 = arith.cmpi slt, %41, %44 : vector<8x256xi32>
    %c0_i32_20 = arith.constant 0 : i32
    %46 = arith.cmpi slt, %39, %c0_i32_20 : i32
    %47 = vector.broadcast %46 : i1 to vector<8x256xi1>
    %48 = vector.broadcast %47 : vector<8x256xi1> to vector<8x256xi1>
    %49 = arith.xori %45, %48 : vector<8x256xi1>
    %50 = arith.andi %49, %43 : vector<8x256xi1>
    %51 = vector.broadcast %39 : i32 to vector<8x256xi32>
    %52 = arith.addi %41, %51 : vector<8x256xi32>
    %53 = arith.select %50, %52, %41 : vector<8x256xi1>, vector<8x256xi32>
    %c0_i32_21 = arith.constant 0 : i32
    %54 = vector.broadcast %c0_i32_21 : i32 to vector<8x256xi32>
    %55 = arith.cmpi eq, %53, %54 : vector<8x256xi32>
    %c255_i32 = arith.constant 255 : i32
    %56 = tpu.dynamic_rotate %19 by %c255_i32 dim 1 : vector<8x256xf32>, i32 -> vector<8x256xf32>
    %c1_i32_22 = arith.constant 1 : i32
    %57 = tpu.dynamic_rotate %19 by %c1_i32_22 dim 1 : vector<8x256xf32>, i32 -> vector<8x256xf32>
    %58 = arith.select %55, %56, %57 : vector<8x256xi1>, vector<8x256xf32>
    %59 = arith.mulf %19, %35 : vector<8x256xf32>
    %60 = arith.mulf %58, %36 : vector<8x256xf32>
    %61 = arith.addf %59, %60 : vector<8x256xf32>
    %cst_23 = arith.constant 0.0883883461 : f32
    %62 = vector.broadcast %cst_23 : f32 to vector<8x256xf32>
    %63 = arith.mulf %61, %62 : vector<8x256xf32>
    %64 = vector.extract_strided_slice %35 {offsets = [0, 0], sizes = [8, 128], strides = [1, 1]} : vector<8x256xf32> to vector<8x128xf32>
    %65 = vector.extract_strided_slice %36 {offsets = [0, 0], sizes = [8, 128], strides = [1, 1]} : vector<8x256xf32> to vector<8x128xf32>
    %66 = tpu.iota {dimensions = array<i32: 1>} : vector<8x128xi32>
    %c2_i32_24 = arith.constant 2 : i32
    %c0_i32_25 = arith.constant 0 : i32
    %67 = arith.cmpi eq, %c2_i32_24, %c0_i32_25 : i32
    %c1_i32_26 = arith.constant 1 : i32
    %68 = arith.select %67, %c1_i32_26, %c2_i32_24 : i32
    %69 = vector.broadcast %68 : i32 to vector<8x128xi32>
    %70 = arith.remsi %66, %69 : vector<8x128xi32>
    %c0_i32_27 = arith.constant 0 : i32
    %71 = vector.broadcast %c0_i32_27 : i32 to vector<8x128xi32>
    %72 = arith.cmpi ne, %70, %71 : vector<8x128xi32>
    %c0_i32_28 = arith.constant 0 : i32
    %73 = vector.broadcast %c0_i32_28 : i32 to vector<8x128xi32>
    %74 = arith.cmpi slt, %70, %73 : vector<8x128xi32>
    %c0_i32_29 = arith.constant 0 : i32
    %75 = arith.cmpi slt, %68, %c0_i32_29 : i32
    %76 = vector.broadcast %75 : i1 to vector<8x128xi1>
    %77 = vector.broadcast %76 : vector<8x128xi1> to vector<8x128xi1>
    %78 = arith.xori %74, %77 : vector<8x128xi1>
    %79 = arith.andi %78, %72 : vector<8x128xi1>
    %80 = vector.broadcast %68 : i32 to vector<8x128xi32>
    %81 = arith.addi %70, %80 : vector<8x128xi32>
    %82 = arith.select %79, %81, %70 : vector<8x128xi1>, vector<8x128xi32>
    %c0_i32_30 = arith.constant 0 : i32
    %83 = vector.broadcast %c0_i32_30 : i32 to vector<8x128xi32>
    %84 = arith.cmpi eq, %82, %83 : vector<8x128xi32>
    %c127_i32 = arith.constant 127 : i32
    %85 = tpu.dynamic_rotate %32 by %c127_i32 dim 1 : vector<8x128xf32>, i32 -> vector<8x128xf32>
    %c1_i32_31 = arith.constant 1 : i32
    %86 = tpu.dynamic_rotate %32 by %c1_i32_31 dim 1 : vector<8x128xf32>, i32 -> vector<8x128xf32>
    %87 = arith.select %84, %85, %86 : vector<8x128xi1>, vector<8x128xf32>
    %88 = arith.mulf %32, %64 : vector<8x128xf32>
    %89 = arith.mulf %87, %65 : vector<8x128xf32>
    %90 = arith.addf %88, %89 : vector<8x128xf32>
    %91 = arith.truncf %63 : vector<8x256xf32> to vector<8x256xbf16>
    %c0_32 = arith.constant 0 : index
    %c0_33 = arith.constant 0 : index
    %c0_34 = arith.constant 0 : index
    %92 = vector.load %arg8[%c0_32, %c0_33, %c0_34] : memref<1x8x256xbf16, #tpu.memory_space<vmem>>, vector<1x8x256xbf16>
    %93 = vector.shape_cast %92 : vector<1x8x256xbf16> to vector<8x256xbf16>
    %94 = vector.shape_cast %91 : vector<8x256xbf16> to vector<1x8x256xbf16>
    tpu.vector_store %arg8[%c0_32, %c0_33, %c0_34], %94 {strides = array<i32>} : memref<1x8x256xbf16, #tpu.memory_space<vmem>>, vector<1x8x256xbf16>,
    %95 = arith.truncf %90 : vector<8x128xf32> to vector<8x128xbf16>
    %96 = tpu.transpose %95, [1, 0] : vector<8x128xbf16> -> vector<128x8xbf16>
    %c0_35 = arith.constant 0 : index
    %c0_36 = arith.constant 0 : index
    %c0_37 = arith.constant 0 : index
    %97 = vector.load %arg9[%c0_35, %c0_36, %c0_37] : memref<1x128x8xbf16, #tpu.memory_space<vmem>>, vector<1x128x8xbf16>
    %98 = vector.shape_cast %97 : vector<1x128x8xbf16> to vector<128x8xbf16>
    %99 = vector.shape_cast %96 : vector<128x8xbf16> to vector<1x128x8xbf16>
    tpu.vector_store %arg9[%c0_35, %c0_36, %c0_37], %99 {strides = array<i32>} : memref<1x128x8xbf16, #tpu.memory_space<vmem>>, vector<1x128x8xbf16>,
    %100 = arith.truncf %6 : vector<8x128xf32> to vector<8x128xbf16>
    %c0_38 = arith.constant 0 : index
    %c0_39 = arith.constant 0 : index
    %c0_40 = arith.constant 0 : index
    %101 = vector.load %arg10[%c0_38, %c0_39, %c0_40] : memref<1x8x128xbf16, #tpu.memory_space<vmem>>, vector<1x8x128xbf16>
    %102 = vector.shape_cast %101 : vector<1x8x128xbf16> to vector<8x128xbf16>
    %103 = vector.shape_cast %100 : vector<8x128xbf16> to vector<1x8x128xbf16>
    tpu.vector_store %arg10[%c0_38, %c0_39, %c0_40], %103 {strides = array<i32>} : memref<1x8x128xbf16, #tpu.memory_space<vmem>>, vector<1x8x128xbf16>,
    return
  }
  func.func @transform_0(%arg0: i32, %arg1: i32) -> (i32, i32, i32) {
    %c0_i32 = arith.constant 0 : i32
    %c0_i32_0 = arith.constant 0 : i32
    return %arg0, %arg1, %c0_i32 : i32, i32, i32
  }
  func.func @transform_1(%arg0: i32, %arg1: i32) -> (i32, i32) {
    %c0_i32 = arith.constant 0 : i32
    %c0_i32_0 = arith.constant 0 : i32
    %c0_i32_1 = arith.constant 0 : i32
    return %c0_i32, %c0_i32_0 : i32, i32
  }
  func.func @transform_2(%arg0: i32, %arg1: i32) -> (i32, i32) {
    %c0_i32 = arith.constant 0 : i32
    %c0_i32_0 = arith.constant 0 : i32
    %c0_i32_1 = arith.constant 0 : i32
    return %c0_i32, %c0_i32_0 : i32, i32
  }
  func.func @transform_3(%arg0: i32, %arg1: i32) -> (i32, i32) {
    %c0_i32 = arith.constant 0 : i32
    %c0_i32_0 = arith.constant 0 : i32
    %c0_i32_1 = arith.constant 0 : i32
    return %c0_i32, %c0_i32_0 : i32, i32
  }
  func.func @transform_4(%arg0: i32, %arg1: i32) -> (i32, i32) {
    %c0_i32 = arith.constant 0 : i32
    %c0_i32_0 = arith.constant 0 : i32
    return %arg1, %c0_i32 : i32, i32
  }
  func.func @transform_5(%arg0: i32, %arg1: i32) -> (i32, i32) {
    %c0_i32 = arith.constant 0 : i32
    %c0_i32_0 = arith.constant 0 : i32
    return %arg1, %c0_i32 : i32, i32
  }
  func.func @transform_6(%arg0: i32, %arg1: i32) -> (i32, i32, i32) {
    %c0_i32 = arith.constant 0 : i32
    %c0_i32_0 = arith.constant 0 : i32
    return %arg0, %arg1, %c0_i32 : i32, i32, i32
  }
  func.func @transform_7(%arg0: i32, %arg1: i32) -> (i32, i32, i32) {
    %c0_i32 = arith.constant 0 : i32
    %c0_i32_0 = arith.constant 0 : i32
    return %arg0, %c0_i32, %arg1 : i32, i32, i32
  }
  func.func @transform_8(%arg0: i32, %arg1: i32) -> (i32, i32, i32) {
    %c0_i32 = arith.constant 0 : i32
    %c0_i32_0 = arith.constant 0 : i32
    return %arg0, %arg1, %c0_i32 : i32, i32, i32
  }
}

</mosaic_0001>

<bundles_post_ra>
// kernel: tpu_custom_call.1
= control target key start
LH: loop header
LB: loop body
LE: loop exit
PB: predicated region body
PF: predicated region fallthrough
CT: control target
= control target key end

     0   :  { %s1788_s0 = inlined_call_operand.hbm [shape: bf16[2,8,32], index: 0, kind: input, shape index: {}]   ;;  %s1789_s1 = inlined_call_operand.hbm [shape: bf16[32,512], index: 1, kind: input, shape index: {}]   ;;  %s1790_s2 = inlined_call_operand.vmem [shape: f32[1,256], index: 2, kind: input, shape index: {}]   ;;  %s1791_s3 = inlined_call_operand.hbm [shape: f32[1,128], index: 3, kind: input, shape index: {}]   ;;  %s1792_s4 = inlined_call_operand.vmem [shape: f32[8,128], index: 4, kind: input, shape index: {}]   ;;  %s1793_s5 = inlined_call_operand.vmem [shape: f32[8,128], index: 5, kind: input, shape index: {}]   ;;  %s1794_s6 = inlined_call_operand.hbm [shape: bf16[2,8,256], index: 6, kind: output, shape index: {0}]   ;;  %s1795_s7 = inlined_call_operand.vmem [shape: bf16[2,128,8], index: 7, kind: output, shape index: {1}]   ;;  %s1796_s8 = inlined_call_operand.hbm [shape: bf16[2,8,128], index: 8, kind: output, shape index: {2}]  }
   0x1   :  { %1803 = sst [smem:[#allocation17_spill]] %s1795_s7 }
   0x2   :  { %14 = vsyncpa [#allocation3], 0 }
   0x3   :  { %16 = vsyncpa [#allocation3 + $0x1], 0 }
   0x4   :  { %17 = vsyncpa [#allocation6], 0 }
   0x5   :  { %18 = vsyncpa [#allocation4], 0 }
   0x6   :  { %20 = vsyncpa [#allocation4 + $0x1], 0 }
   0x7   :  { %21 = vsyncpa [#allocation10], 0 }
   0x8   :  { %23 = vsyncpa [#allocation10 + $0x1], 0  ;;  %s1446_s27 = smov 0   ;;  %s1448_s28 = smov 0  }
   0x9   :  { %s1450_s29 = smov 0   ;;  %s1452_s30 = smov 0  }
   0xa   :  { %s1454_s9 = smov 0   ;;  %s1456_s10 = smov 0  }
   0xb LB: > { %1804 = sst [smem:[#allocation15_spill]] %s1369_s27  ;;  %s1020_s11 = sadd.s32 4294967295, %s1389_s10   ;;  %s1389_s10 = sphi %s1456_s10, %s29_s10   ;;  %s1385_s9 = sphi %s1454_s9, %s1828_s9   ;;  %s1381_s30 = sphi %s1452_s30, %s1827_s30   ;;  %s1377_s29 = sphi %s1450_s29, %s1826_s29   ;;  %s1373_s28 = sphi %s1448_s28, %s1825_s28   ;;  %s1369_s27 = sphi %s1446_s27, %s1824_s27  }
   0xc   : > { %s1021_s12 = sadd.s32 4294967294, %s1389_s10   ;;  %p63_p0 = scmp.ne.s32.totalorder %s1373_s28, %s1369_s27 }
   0xd   : > { %p1480_p1 = scmp.eq.s32.totalorder %s1020_s11, 0  ;;  %p1484_p2 = scmp.eq.s32.totalorder %s1020_s11, 1 }
   0xe   : > { %p210_p3 = scmp.eq.s32.totalorder %s1021_s12, 1  ;;  %p1022_p5 = scmp.ge.s32.totalorder %s1389_s10, 1 }
   0xf   : > { %s1805_s13 = scalar_select %p1480_p1, 1, 0 }
  0x10   : > { %p1490_p4 = por %p1480_p1, %p63_p0  ;;  %p1495_p6 = por %p210_p3, %p63_p0 }
  0x11   : > { %p273_p7 = scmp.lt.s32.totalorder %s1389_s10, 3  ;;  %s1391_s18 = smov [#allocation5]  }
  0x12   : > { %s1807_s15 = scalar_select %p1490_p4, 1, 0 }
  0x13   : > { %s1808_s16 = scalar_select %p1495_p6, 1, 0 }
  0x14   : > { %p1500_p8 = pnand %p1022_p5, %p273_p7  ;;  %s285_s19 = sshll.u32 %s1391_s18, 4  ;;  %s1504_s19 = int_to_ptr.vmem [resolvable:$true] %s285_s19 }
  0x15   : > { %1809 = sst [smem:[#allocation16_spill]] %s1808_s16  ;;  %s1392_s21 = smov [#allocation7]  }
  0x16   : > { %p1090_p9 = pneg %p1500_p8  ;;  %s302_s22 = sshll.u32 %s1392_s21, 4  ;;  %s1515_s22 = int_to_ptr.vmem [resolvable:$true] %s302_s22 }
  0x17   : > { %s1185_s25 = scalar_lea.hbm %s1789_s1, 1024 }
  0x18   : > { %p1511_p11 = pnand %p1090_p9, %p1480_p1  ;;  %p1186_p12 = scmp.ne.s32.totalorder %s1789_s1, %s1185_s25 }
  0x19   : > { %p1192_p5 = scmp.lt.u32.totalorder %s1185_s25, %s1789_s1 }
  0x1a   : > { %p1187_p13 = pneg %p1511_p11 }
  0x1c   : > { %p1188_p0 = pnand %p1187_p13, %p1186_p12 }
  0x1e   : > { %p1189_p3 = pneg %p1188_p0 }
  0x20   : > { %p1194_p7 = pnand %p1192_p5, %p1189_p3 }
  0x22   : > { %1197 = shalt.err (!%p1194_p7)
}
  0x23   : > { %s1198_s21 = scalar_lea.vmem %s1504_s19, 1024  ;;  %p1206_p1 = scmp.lt.s32.totalorder %s1504_s19, %s1504_s19 }
  0x24   : > { %p1199_p9 = scmp.ne.s32.totalorder %s1504_s19, %s1198_s21  ;;  %p1207_p12 = scmp.lt.s32.totalorder %s1198_s21, %s1198_s21 }
  0x26   : > { %p1201_p10 = pnand %p1199_p9, %p1187_p13  ;;  %p1208_p0 = por %p1207_p12, %p1206_p1 }
  0x28   : > { %p1202_p6 = pneg %p1201_p10 }
  0x2a   : > { %p1209_p4 = pnand %p1208_p0, %p1202_p6 }
  0x2c   : > { %1212 = shalt.err (!%p1209_p4)
}
  0x2d   : > { %s1393_s23 = smov 256   ;;  %s1394_s24 = smov 16  }
  0x2e   : > { %1093 = dma.hbm_to_vmem [thread:$0]  (!%p1511_p11), %s1789_s1, 1024, %s1504_s19, [#allocation6], %s1393_s23, %s1393_s23, %s1394_s24  }
  0x2f   : > { %s1213_s18 = scalar_lea.hbm %s1791_s3, 16 }
  0x30   : > { %p1214_p1 = scmp.ne.s32.totalorder %s1791_s3, %s1213_s18  ;;  %p1220_p10 = scmp.lt.u32.totalorder %s1213_s18, %s1791_s3 }
  0x32   : > { %p1216_p4 = pnand %p1214_p1, %p1187_p13 }
  0x34   : > { %p1217_p6 = pneg %p1216_p4 }
  0x36   : > { %p1222_p3 = pnand %p1220_p10, %p1217_p6 }
  0x38   : > { %1225 = shalt.err (!%p1222_p3)
}
  0x39   : > { %s1226_s19 = scalar_lea.vmem %s1515_s22, 16  ;;  %s1233_s27 = scalar_lea.vmem %s1515_s22, 32 }
  0x3a   : > { %p1227_p5 = scmp.ne.s32.totalorder %s1515_s22, %s1226_s19  ;;  %p1234_p12 = scmp.lt.s32.totalorder %s1515_s22, %s1515_s22 }
  0x3b   : > { %p1235_p0 = scmp.lt.s32.totalorder %s1233_s27, %s1226_s19 }
  0x3c   : > { %p1229_p7 = pnand %p1227_p5, %p1187_p13 }
  0x3d   : > { %p1236_p1 = por %p1235_p0, %p1234_p12 }
  0x3e   : > { %p1230_p9 = pneg %p1229_p7 }
  0x40   : > { %p1237_p4 = pnand %p1236_p1, %p1230_p9 }
  0x42   : > { %1240 = shalt.err (!%p1237_p4)
}
  0x43   : > { %1096 = dma.hbm_to_vmem [thread:$0]  (!%p1511_p11), %s1791_s3, 16, %s1515_s22, [#allocation6]  }
  0x44   : > { %s41_s23 = sadd.s32 1, %s1385_s9  ;;  %s50_s24 = sadd.s32 1, %s1377_s29 }
  0x45   : > { %p43_p13 = scmp.ge.s32.totalorder %s41_s23, 2  ;;  %p57_p6 = scmp.ne.s32.totalorder %s1377_s29, %s1373_s28 }
  0x46   : > { %p58_p10 = scmp.eq.s32.totalorder %s1389_s10, 0  ;;  %p1110_p3 = scmp.lt.s32.totalorder %s1389_s10, 2 }
  0x47   : > { %s1830_s23 = smov (%p43_p13, %s41_s23), 0  ;;  %p1580_p7 = por %p1484_p2, %p57_p6 }
  0x48   : > { %p59_p5 = por %p58_p10, %p57_p6  ;;  %s45_s25 = ssub.s32 %s1385_s9, %s1830_s23 }
  0x49   : > { %s1812_s20 = scalar_select %p1580_p7, 1, 0 }
  0x4a   : > { %s327_s26 = sand.u32 1, %s1377_s29   ;;  %p48_p9 = scmp.eq.s32.totalorder %s45_s25, 0 }
  0x4b   : > { %s1028_s22 = sshll.u32 %s327_s26, 2  ;;  %s1029_s11 = sshll.u32 %s1385_s9, 6 }
  0x4c   : > { %s1589_s12 = scalar_select %p48_p9, %s1377_s29, %s50_s24  }
  0x4d   : > { %s1594_s19 = scalar_lea.hbm %s1788_s0, %s1029_s11  ;;  %s331_s14 = scalar_lea.vmem [#allocation2], %s1028_s22 }
  0x4e   : > { %s339_s27 = sshll.u32 %s331_s14, 4  ;;  %p1598_p2 = pnand %p1110_p3, %p59_p5  ;;  %s1602_s27 = int_to_ptr.vmem [resolvable:$true] %s339_s27 }
  0x4f   : > { %s328_s16 = scalar_lea.sflag [#allocation3], %s327_s26  ;;  %s1241_s24 = scalar_lea.hbm %s1594_s19, 64 }
  0x50   : > { %p1242_p11 = scmp.ne.s32.totalorder %s1594_s19, %s1241_s24  ;;  %p1243_p12 = pneg %p1598_p2 }
  0x51   : > { %s1246_s11 = scalar_lea.hbm %s1788_s0, 128  ;;  %p1247_p4 = scmp.lt.u32.totalorder %s1594_s19, %s1788_s0 }
  0x52   : > { %p1244_p0 = pnand %p1243_p12, %p1242_p11  ;;  %p1248_p13 = scmp.lt.u32.totalorder %s1246_s11, %s1241_s24 }
  0x53   : > { %p1250_p10 = scmp.lt.u32.totalorder %s1241_s24, %s1594_s19 }
  0x54   : > { %p1245_p1 = pneg %p1244_p0  ;;  %p1249_p6 = por %p1248_p13, %p1247_p4 }
  0x56   : > { %p1251_p3 = por %p1250_p10, %p1249_p6 }
  0x58   : > { %p1252_p5 = pnand %p1251_p3, %p1245_p1 }
  0x5a   : > { %1255 = shalt.err (!%p1252_p5)
}
  0x5b   : > { %s1256_s26 = scalar_lea.vmem %s1602_s27, 64  ;;  %s1395_s14 = smov [#allocation2]  }
  0x5c   : > { %p1257_p9 = scmp.ne.s32.totalorder %s1602_s27, %s1256_s26  ;;  %s1261_s25 = sshll.u32 %s1395_s14, 4  ;;  %s1262_s25 = int_to_ptr.vmem [resolvable:$false] %s1261_s25 }
  0x5d   : > { %s1263_s22 = scalar_lea.vmem %s1262_s25, 128  ;;  %p1264_p7 = scmp.lt.s32.totalorder %s1602_s27, %s1262_s25 }
  0x5e   : > { %p1259_p11 = pnand %p1257_p9, %p1243_p12  ;;  %p1265_p4 = scmp.lt.s32.totalorder %s1263_s22, %s1256_s26 }
  0x60   : > { %p1260_p0 = pneg %p1259_p11  ;;  %p1266_p13 = por %p1265_p4, %p1264_p7 }
  0x62   : > { %p1267_p6 = pnand %p1266_p13, %p1260_p0 }
  0x64   : > { %1270 = shalt.err (!%p1267_p6)
}
  0x65   : > { %1100 = dma.hbm_to_vmem [thread:$0]  (!%p1598_p2), %s1594_s19, 64, %s1602_s27, %s328_s16  }
  0x66   : > { %348 = sbr.rel (%p1500_p8) target bundleno = 758 (0x2f6), region = 44  ;;  %s1632_s24 = sand.u32 (!%p1500_p8), 1, %s1373_s28  }
  0x67   : > { %s1031_s11 = sshll.u32 (!%p1500_p8), %s1632_s24, 2  ;;  %s351_s18 = scalar_lea.sflag (!%p1500_p8), [#allocation3], %s1632_s24 }
  0x68   : > { %s354_s21 = scalar_lea.vmem (!%p1500_p8), [#allocation2], %s1031_s11  ;;  %p1814_p7 = scmp.ne.s32.totalorder (!%p1500_p8), %s1807_s15, 0 }
  0x6d   : > { %1352 = dma.done.wait (%p1814_p7), %s351_s18, 64  }
  0x6e   : > { %1354 = vsyncadd (%p1814_p7), %s351_s18, 4294967232  ;;  %p1815_p2 = scmp.ne.s32.totalorder %s1805_s13, 0 }
  0x70   : > { %1356 = dma.done.wait (%p1815_p2), [#allocation6], 1040  }
  0x71   : > { %1358 = vsyncadd (%p1815_p2), [#allocation6], 4294966256  ;;  %v1396_v0 = vmov 0   ;;  %v1169_v1 = vld [vmem:[#allocation5 + $0xc] ss:$16 sps:$4 sm:$0xff]   ;;  %vm482_vm0 = vcmask 261120   ;;  %v581_v28 = vlaneseq }
  0x72   : > { %559 = vmatprep.mubr.bf16.mxu1 %v1396_v0  ;;  %518 = vmatprep.mubr.bf16.mxu0 %v1396_v0  ;;  %v1171_v2 = vld [vmem:[#allocation5 + $0x4] ss:$16 sps:$4 sm:$0xff]   ;;  %v1173_v3 = vld [vmem:[#allocation5 + $0x8] ss:$16 sps:$4 sm:$0xff]   ;;  %v1174_v4 = vld [vmem:[#allocation5] ss:$16 sps:$4 sm:$0xff]  }
  0x73   : > { %527 = vmatprep.subr.bf16.mxu1 %v1169_v1  ;;  %486 = vmatprep.subr.bf16.mxu0 %v1171_v2  ;;  %v1175_v5 = vld [vmem:[#allocation5 + $0x2c] ss:$16 sps:$4 sm:$0xff]   ;;  %v1177_v6 = vld [vmem:[#allocation5 + $0x24] ss:$16 sps:$4 sm:$0xff]   ;;  %v1179_v7 = vld [vmem:[#allocation5 + $0x28] ss:$16 sps:$4 sm:$0xff]  }
  0x74   : > { %528 = vmatpush1.bf16.msra.mxu1 %v1173_v3  ;;  %487 = vmatpush1.bf16.msra.mxu0 %v1174_v4  ;;  %v1180_v8 = vld [vmem:[#allocation5 + $0x20] ss:$16 sps:$4 sm:$0xff]   ;;  %v433_v9 = vld [vmem:[%s354_s21] sm:$0xf]  ;;  %s1648_s13 = scalar_lea.vmem [#allocation9], %s1031_s11  ;;  %v582_v30 = vshrl.u32 %v581_v28, 7 }
  0x75   : > { %529 = vmatprep.subr.bf16.mxu1 %v1175_v5  ;;  %488 = vmatprep.subr.bf16.mxu0 %v1177_v6  ;;  %v1048_v33 = vld [vmem:[#allocation7] ss:$0 sm:$0xff]  ;;  %v568_v34 = vld [vmem:[%s1790_s2] sm:$0x3]  ;;  %s1397_s19 = smov 127   ;;  %s1398_s27 = smov 1  }
  0x76   : > { %v583_v31 = vsub.s32 0, %v582_v30  ;;  %v587_v38 = vsub.s32 1, %v582_v30  ;;  %v612_v45 = vand.u32 127, %v581_v28  ;;  %v610_v49 = vld [vmem:[%s1793_s5] sm:$0xff]  ;;  %s1034_s25 = sshll.u32 %s1632_s24, 3  ;;  %s1070_s22 = sshll.u32 %s1381_s30, 6 }
  0x77   : > { %v609_v50 = vld [vmem:[%s1792_s4] sm:$0xff]  ;;  %s820_s11 = sshll.u32 %s1648_s13, 4  ;;  %s1674_s15 = scalar_lea.hbm %s1796_s8, %s1070_s22  ;;  %s821_s11 = int_to_ptr.vmem [resolvable:$true] %s820_s11 }
  0x78   : > { %530 = vmatpush1.bf16.msra.mxu1 %v1179_v7  ;;  %489 = vmatpush1.bf16.msra.mxu0 %v1180_v8  ;;  %v584_v37 = vrot.slane %v568_v34, %v583_v31  ;;  %v588_v43 = vrot.slane %v568_v34, %v587_v38  ;;  %v618_v46 = vand.u32 1, %v612_v45  ;;  %v613_v55 = vadd.s32 128, %v612_v45  ;;  %s787_s17 = scalar_lea.sflag [#allocation10], %s1632_s24  ;;  %p1818_p12 = scmp.ne.s32.totalorder %s1812_s20, 0 }
  0x79   : > { %vm644_vm2 = vcmp.lt.s32.totalorder %v612_v45, 127  ;;  %vm651_vm3 = vcmp.lt.s32.totalorder %v612_v45, 1 }
  0x7a   : > { %vm1654_vm1 = vcmp.eq.s32.totalorder %v618_v46, 0  ;;  %v625_v59 = vand.u32 1, %v613_v55 }
  0x7b   : > { %1047 = vmatmul.mubr.msk.bf16.vlgmr.msra.gmra.mrb[0].mxu1 %vm482_vm0, %v433_v9  ;;  %1046 = vmatmul.mubr.msk.bf16.vlgmr.msra.gmra.mrb[0].mxu0 %vm482_vm0, %v433_v9 }
  0x7c   : > { %vm639_vm4 = vcmp.eq.s32.totalorder %v625_v59, 0 }
 0x14e   : > { %v561_v10 = vpop.f32.mrb[0].mxu1  ;;  %v520_v11 = vpop.f32.mrb[0].mxu0 }
 0x14f   : > { %v569_v12 = vmul.f32 %v520_v11, %v520_v11  ;;  %v563_v13 = vpop.f32.mrb[1].mxu1  ;;  %v522_v14 = vpop.f32.mrb[1].mxu0  ;;  %v594_v15 = vmul.f32 %v561_v10, %v561_v10 }
 0x150   : > { %v771_v16 = vpack.c.bf16 %v563_v13, %v563_v13  ;;  %v570_v17 = vmul.f32 %v522_v14, %v522_v14  ;;  %v565_v18 = vpop.f32.mrb[2].mxu1  ;;  %v524_v19 = vpop.f32.mrb[2].mxu0 }
 0x151   : > { %595 = vadd.xlane.f32.xlu0 %v594_v15  ;;  %v566_v20 = vpop.f32.mrb[3].mxu1  ;;  %v525_v21 = vpop.f32.mrb[3].mxu0 }
 0x152   : > { %772 = vst [vmem:[%s1648_s13] sm:$0xf] %v771_v16  ;;  %v571_v22 = vadd.f32 %v570_v17, %v569_v12 }
 0x155   : > { %572 = vadd.xlane.f32.xlu0 %v571_v22 }
 0x1de   : > { %v596_v23 = vpop.xlane.xlu0 %595 }
 0x1df   : > { %v598_v24 = vmul.f32 0.0078125, %v596_v23 }
 0x1e1   : > { %v599_v25 = vadd.f32 1e-06, %v598_v24 }
 0x1e2   : > { %v573_v26 = vpop.xlane.xlu0 %572 }
 0x1e3   : > { %1181 = vrsqrt.f32 %v599_v25  ;;  %v575_v27 = vmul.f32 0.00390625, %v573_v26 }
 0x1e5   : > { %v576_v29 = vadd.f32 1e-06, %v575_v27 }
 0x1e7   : > { %1183 = vrsqrt.f32 %v576_v29 }
 0x1ed   : > { %v1182_v32 = vpop.eup %1181 }
 0x1ee   : > { %v601_v35 = vmul.f32 %v1182_v32, %v561_v10 }
 0x1f0   : > { %v608_v36 = vmul.f32 %v1048_v33, %v601_v35 }
 0x1f1   : > { %v1184_v39 = vpop.eup %1183 }
 0x1f2   : > { %664 = vrot.lane.b32.xlu1 %v608_v36, %s1397_s19  ;;  %v578_v40 = vmul.f32 %v1184_v39, %v520_v11  ;;  %v579_v42 = vmul.f32 %v1184_v39, %v522_v14  ;;  %v669_v54 = vmul.f32 %v609_v50, %v608_v36 }
 0x1f4   : > { %v591_v41 = vmul.f32 %v584_v37, %v578_v40  ;;  %v592_v44 = vmul.f32 %v588_v43, %v579_v42 }
 0x1f6   : > { %666 = vrot.lane.b32.xlu1 %v608_v36, %s1398_s27  ;;  %640 = vrot.lane.b32.xlu0 %v591_v41, %s1397_s19  ;;  %v657_v5 = vmul.f32 %v609_v50, %v592_v44  ;;  %v656_v6 = vmul.f32 %v609_v50, %v591_v41 }
 0x1fa   : > { %642 = vrot.lane.b32.xlu1 %v592_v44, %s1397_s19  ;;  %s1271_s19 = scalar_lea.vmem %s821_s11, 64 }
 0x1fb   : > { %p1272_p8 = scmp.ne.s32.totalorder %s821_s11, %s1271_s19 }
 0x1fd   : > { %p1273_p1 = pnand %p1272_p8, %p1818_p12 }
 0x1fe   : > { %647 = vrot.lane.b32.xlu1 %v591_v41, %s1398_s27 }
 0x1ff   : > { %p1274_p10 = pneg %p1273_p1 }
 0x202   : > { %649 = vrot.lane.b32.xlu1 %v592_v44, %s1398_s27  ;;  %s1399_s27 = smov [#allocation9]  }
 0x203   : > { %s1275_s7 = sshll.u32 %s1399_s27, 4  ;;  %s1276_s7 = int_to_ptr.vmem [resolvable:$false] %s1275_s7 }
 0x204   : > { %s1277_s13 = scalar_lea.vmem %s1276_s7, 128  ;;  %p1278_p3 = scmp.lt.s32.totalorder %s821_s11, %s1276_s7 }
 0x205   : > { %p1279_p5 = scmp.lt.s32.totalorder %s1277_s13, %s1271_s19 }
 0x207   : > { %p1280_p9 = por %p1279_p5, %p1278_p3 }
 0x209   : > { %p1281_p11 = pnand %p1280_p9, %p1274_p10 }
 0x264   : > { %v665_v47 = vpop.permute.xlu1 %664 }
 0x268   : > { %v667_v51 = vpop.permute.xlu1 %666  ;;  %v641_v61 = vpop.permute.xlu0 %640 }
 0x269   : > { %v668_v52 = vsel %vm1654_vm1, %v665_v47, %v667_v51 }
 0x26a   : > { %v670_v53 = vmul.f32 %v668_v52, %v610_v49 }
 0x26c   : > { %v643_v56 = vpop.permute.xlu1 %642  ;;  %v671_v57 = vadd.f32 %v670_v53, %v669_v54 }
 0x26d   : > { %v645_v63 = vsel %vm644_vm2, %v641_v61, %v643_v56  ;;  %v646_v0 = vsel %vm644_vm2, %v643_v56, %v641_v61 }
 0x26e   : > { %v681_v58 = vpack.c.bf16 %v671_v57, %v671_v57 }
 0x270   : > { %682 = vxpose.xlu1.c.b16.start.end [1/1] (short) %v681_v58, 128  ;;  %v648_v60 = vpop.permute.xlu1 %647 }
 0x274   : > { %v650_v62 = vpop.permute.xlu1 %649 }
 0x275   : > { %v652_v1 = vsel %vm651_vm3, %v648_v60, %v650_v62  ;;  %v653_v2 = vsel %vm651_vm3, %v650_v62, %v648_v60 }
 0x276   : > { %v654_v3 = vsel %vm1654_vm1, %v645_v63, %v653_v2  ;;  %v655_v4 = vsel %vm639_vm4, %v646_v0, %v652_v1 }
 0x277   : > { %v658_v7 = vmul.f32 %v654_v3, %v610_v49  ;;  %v659_v8 = vmul.f32 %v655_v4, %v610_v49 }
 0x278   : > { %1284 = shalt.err (!%p1281_p11)
}
 0x279   : > { %s1285_s16 = scalar_lea.hbm %s1674_s15, 64  ;;  %s1289_s22 = scalar_lea.hbm %s1796_s8, 128 }
 0x27a   : > { %p1286_p0 = scmp.ne.s32.totalorder %s1674_s15, %s1285_s16  ;;  %p1290_p6 = scmp.lt.u32.totalorder %s1674_s15, %s1796_s8 }
 0x27b   : > { %p1291_p7 = scmp.lt.u32.totalorder %s1289_s22, %s1285_s16  ;;  %p1293_p8 = scmp.lt.u32.totalorder %s1285_s16, %s1674_s15 }
 0x27c   : > { %p1287_p4 = pnand %p1286_p0, %p1818_p12 }
 0x27d   : > { %p1292_p2 = por %p1291_p7, %p1290_p6 }
 0x27e   : > { %p1288_p13 = pneg %p1287_p4 }
 0x27f   : > { %p1294_p1 = por %p1293_p8, %p1292_p2 }
 0x281   : > { %p1295_p10 = pnand %p1294_p1, %p1288_p13 }
 0x283   : > { %1298 = shalt.err (!%p1295_p10)
}
 0x284   : > { %1087 = dma.vmem_to_hbm [thread:$0]  (%p1818_p12), %s821_s11, 64, %s1674_s15, %s787_s17   ;;  %v660_v9 = vadd.f32 %v658_v7, %v656_v6  ;;  %v661_v10 = vadd.f32 %v659_v8, %v657_v5 }
 0x285   : > { %s1075_s19 = sshll.u32 %s1381_s30, 7  ;;  %s398_s27 = scalar_lea.vmem [#allocation8], %s1034_s25 }
 0x286   : > { %s803_s7 = sshll.u32 %s398_s27, 4  ;;  %v662_v11 = vmul.f32 0.088388346, %v660_v9  ;;  %v663_v12 = vmul.f32 0.088388346, %v661_v10  ;;  %s1700_s26 = scalar_lea.hbm %s1794_s6, %s1075_s19  ;;  %s1702_s7 = int_to_ptr.vmem [resolvable:$true] %s803_s7 }
 0x287   : > { %s774_s11 = scalar_lea.sflag [#allocation4], %s1632_s24  ;;  %s1299_s15 = scalar_lea.vmem %s1702_s7, 128 }
 0x288   : > { %v1074_v13 = vpack.c.bf16 %v663_v12, %v662_v11  ;;  %p1300_p3 = scmp.ne.s32.totalorder %s1702_s7, %s1299_s15  ;;  %s1400_s25 = smov [#allocation8]  }
 0x289   : > { %s1303_s17 = sshll.u32 %s1400_s25, 4  ;;  %s1304_s17 = int_to_ptr.vmem [resolvable:$false] %s1303_s17 }
 0x28a   : > { %680 = vst [vmem:[%s398_s27] sm:$0xff] %v1074_v13  ;;  %p1301_p5 = pnand %p1300_p3, %p1818_p12  ;;  %s1305_s14 = scalar_lea.vmem %s1304_s17, 256 }
 0x28b   : > { %p1306_p11 = scmp.lt.s32.totalorder %s1702_s7, %s1304_s17  ;;  %p1307_p0 = scmp.lt.s32.totalorder %s1305_s14, %s1299_s15 }
 0x28c   : > { %p1302_p9 = pneg %p1301_p5 }
 0x28d   : > { %p1308_p4 = por %p1307_p0, %p1306_p11 }
 0x28f   : > { %p1309_p13 = pnand %p1308_p4, %p1302_p9 }
 0x291   : > { %1312 = shalt.err (!%p1309_p13)
}
 0x292   : > { %s1313_s24 = scalar_lea.hbm %s1700_s26, 128  ;;  %s1317_s21 = scalar_lea.hbm %s1794_s6, 256 }
 0x293   : > { %p1314_p6 = scmp.ne.s32.totalorder %s1700_s26, %s1313_s24  ;;  %p1318_p8 = scmp.lt.u32.totalorder %s1700_s26, %s1794_s6 }
 0x294   : > { %p1319_p1 = scmp.lt.u32.totalorder %s1317_s21, %s1313_s24  ;;  %p1321_p3 = scmp.lt.u32.totalorder %s1313_s24, %s1700_s26 }
 0x295   : > { %p1315_p7 = pnand %p1314_p6, %p1818_p12 }
 0x296   : > { %p1320_p10 = por %p1319_p1, %p1318_p8 }
 0x297   : > { %p1316_p2 = pneg %p1315_p7 }
 0x298   : > { %p1322_p5 = por %p1321_p3, %p1320_p10 }
 0x29a   : > { %p1323_p9 = pnand %p1322_p5, %p1316_p2 }
 0x29c   : > { %1326 = shalt.err (!%p1323_p9)
}
 0x29d   : > { %1086 = dma.vmem_to_hbm [thread:$0]  (%p1818_p12), %s1702_s7, 128, %s1700_s26, %s774_s11   ;;  %vm754_vm5 = vcmask 60416  }
 0x29e   : > { %p424_p11 = scmp.lt.s32.totalorder %s1381_s30, 1  ;;  %s1819_s25 = sld [smem:[#allocation17_spill]] }
 0x2a0   : > { %s1832_s30 = smov (!%p424_p11, %s1381_s30), 1 }
 0x2a1   : > { %s1073_s13 = sshll.u32 %s1832_s30, 6 }
 0x2a4   : > { %s1731_s17 = scalar_lea.vmem %s1819_s25, %s1073_s13 }
 0x2d6   : > { %v690_v14 = vpop.trf.xlu1 }
 0x2d7   : > { %v1050_v15 = vcombine.low %v690_v14, %v690_v14  ;;  %v1051_v16 = vcombine.high %v690_v14, %v690_v14 }
 0x2d9   : > { %755 = vst.msk [vmem:[%s1731_s17] sm:$0xf] %vm754_vm5, %v1050_v15  ;;  %756 = vst.msk [vmem:[%s1731_s17 + $0x4] sm:$0xf] %vm754_vm5, %v1051_v16 }
 0x2da   : > { %v691_v17 = vpop.trf.xlu1 }
 0x2db   : > { %v1052_v18 = vcombine.low %v691_v17, %v691_v17  ;;  %v1053_v19 = vcombine.high %v691_v17, %v691_v17 }
 0x2dd   : > { %757 = vst.msk [vmem:[%s1731_s17 + $0x8] sm:$0xf] %vm754_vm5, %v1052_v18  ;;  %758 = vst.msk [vmem:[%s1731_s17 + $0xc] sm:$0xf] %vm754_vm5, %v1053_v19 }
 0x2de   : > { %v692_v20 = vpop.trf.xlu1 }
 0x2df   : > { %v1054_v21 = vcombine.low %v692_v20, %v692_v20  ;;  %v1055_v22 = vcombine.high %v692_v20, %v692_v20 }
 0x2e1   : > { %759 = vst.msk [vmem:[%s1731_s17 + $0x10] sm:$0xf] %vm754_vm5, %v1054_v21  ;;  %760 = vst.msk [vmem:[%s1731_s17 + $0x14] sm:$0xf] %vm754_vm5, %v1055_v22 }
 0x2e2   : > { %v693_v23 = vpop.trf.xlu1 }
 0x2e3   : > { %v1056_v24 = vcombine.low %v693_v23, %v693_v23  ;;  %v1057_v25 = vcombine.high %v693_v23, %v693_v23 }
 0x2e5   : > { %761 = vst.msk [vmem:[%s1731_s17 + $0x18] sm:$0xf] %vm754_vm5, %v1056_v24  ;;  %762 = vst.msk [vmem:[%s1731_s17 + $0x1c] sm:$0xf] %vm754_vm5, %v1057_v25 }
 0x2e6   : > { %v694_v26 = vpop.trf.xlu1 }
 0x2e7   : > { %v1058_v27 = vcombine.low %v694_v26, %v694_v26  ;;  %v1059_v28 = vcombine.high %v694_v26, %v694_v26 }
 0x2e9   : > { %763 = vst.msk [vmem:[%s1731_s17 + $0x20] sm:$0xf] %vm754_vm5, %v1058_v27  ;;  %764 = vst.msk [vmem:[%s1731_s17 + $0x24] sm:$0xf] %vm754_vm5, %v1059_v28 }
 0x2ea   : > { %v695_v29 = vpop.trf.xlu1 }
 0x2eb   : > { %v1060_v30 = vcombine.low %v695_v29, %v695_v29  ;;  %v1061_v31 = vcombine.high %v695_v29, %v695_v29 }
 0x2ed   : > { %765 = vst.msk [vmem:[%s1731_s17 + $0x28] sm:$0xf] %vm754_vm5, %v1060_v30  ;;  %766 = vst.msk [vmem:[%s1731_s17 + $0x2c] sm:$0xf] %vm754_vm5, %v1061_v31 }
 0x2ee   : > { %v696_v32 = vpop.trf.xlu1 }
 0x2ef   : > { %v1062_v33 = vcombine.low %v696_v32, %v696_v32  ;;  %v1063_v34 = vcombine.high %v696_v32, %v696_v32 }
 0x2f1   : > { %767 = vst.msk [vmem:[%s1731_s17 + $0x30] sm:$0xf] %vm754_vm5, %v1062_v33  ;;  %768 = vst.msk [vmem:[%s1731_s17 + $0x34] sm:$0xf] %vm754_vm5, %v1063_v34 }
 0x2f2   : > { %v697_v35 = vpop.trf.xlu1 }
 0x2f3   : > { %v1064_v36 = vcombine.low %v697_v35, %v697_v35  ;;  %v1065_v37 = vcombine.high %v697_v35, %v697_v35 }
 0x2f5   : > { %769 = vst.msk [vmem:[%s1731_s17 + $0x38] sm:$0xf] %vm754_vm5, %v1064_v36  ;;  %770 = vst.msk [vmem:[%s1731_s17 + $0x3c] sm:$0xf] %vm754_vm5, %v1065_v37 }
 0x2f6 PF: > { %s1820_s30 = sld [smem:[#allocation15_spill]]  ;;  %s1821_s20 = sld [smem:[#allocation16_spill]] }
 0x2f7   : > { %p1823_p0 = scmp.ge.s32.totalorder %s1389_s10, 2 }
 0x2fc   : > { %s832_s7 = sand.u32 1, %s1820_s30   ;;  %p1822_p12 = scmp.ne.s32.totalorder %s1821_s20, 0 }
 0x2fd   : > { %s833_s26 = scalar_lea.sflag [#allocation4], %s832_s7 }
 0x2fe   : > { %p1102_p4 = pnand %p1823_p0, %p1822_p12 }
 0x300   : > { %1360 = dma.done.wait (!%p1102_p4), %s833_s26, 128  }
 0x301   : > { %1362 = vsyncadd (!%p1102_p4), %s833_s26, 4294967168  ;;  %s853_s11 = scalar_lea.sflag [#allocation10], %s832_s7 }
 0x302   : > { %1364 = dma.done.wait (!%p1102_p4), %s853_s11, 64  }
 0x303   : > { %1366 = vsyncadd (!%p1102_p4), %s853_s11, 4294967232  ;;  %s29_s10 = sadd.s32 1, %s1389_s10   ;;  %s1824_s27 = smov %s1373_s28 }
 0x304   : > { %p26_p13 = scmp.ge.s32.totalorder %s29_s10, 4   ;;  %s1825_s28 = smov %s1377_s29 }
 0x305   : > { %s1826_s29 = smov %s1589_s12  ;;  %s1827_s30 = smov %s1385_s9 }
 0x306   : > { %s1828_s9 = smov %s1830_s23  ;;  %28 = sbr.rel (!%p26_p13) target bundleno = 11 (0xb), region = 132 }
 0x30d   :  { %858 = vsyncpa [#allocation3], 1 }
 0x30e   :  { %860 = vsyncpa [#allocation3 + $0x1], 1 }
 0x30f   :  { %861 = vsyncpa [#allocation6], 1 }
 0x310   :  { %862 = vsyncpa [#allocation4], 1 }
 0x311   :  { %864 = vsyncpa [#allocation4 + $0x1], 1 }
 0x312   :  { %865 = vsyncpa [#allocation10], 1 }
 0x313   :  { %867 = vsyncpa [#allocation10 + $0x1], 1 }

</bundles_post_ra>
